<compile_context>
chip_gen: v6e
topology: v6e:2x2x1
jax: 0.10.0
libtpu: 0.0.40
codegen_flags: <defaults>
</compile_context>

<pallas_src>
import functools

import jax
import jax.numpy as jnp
from jax.experimental import pallas as pl
from jax.experimental.pallas import tpu as pltpu


def _round_up(x, m):
    return ((x + m - 1) // m) * m


def _andp_kernel(x_ref, xt_ref, w1_ref, b1_ref, w2_ref, b2_ref, a_ref, e_ref,
                 o_ref, *, n_systems):
    """One batch tile; batch lives in the lane (minor) dimension.

    x_ref : (D, TB)    current states (columns = batch elements)
    xt_ref: (D, 1)     attractor
    w1_ref: (H, D), b1_ref: (H, 1)   first Linear (PyTorch (out,in) layout -> no transpose)
    w2_ref: (N, H), b2_ref: (N, 1)   second Linear
    a_ref : (D, N*D)   hstack of A_i:  a_ref[d, i*D + k] = A_i[d, k]
    e_ref : (N*D, N)   kron(I_N, ones((D,1))) expansion matrix
    o_ref : (D, TB)
    """
    x = x_ref[...]
    diff = xt_ref[...] - x                                        # (D, TB)

    # --- weighting MLP: Linear -> ReLU -> Linear -> softmax over N (sublane axis) ---
    h = jnp.dot(w1_ref[...], x, preferred_element_type=jnp.float32) + b1_ref[...]
    h = jnp.maximum(h, 0.0)                                       # (H, TB)
    logits = jnp.dot(w2_ref[...], h, preferred_element_type=jnp.float32) + b2_ref[...]
    m = jnp.max(logits, axis=0, keepdims=True)                    # (1, TB)
    ez = jnp.exp(logits - m)
    # exact reciprocal: approx=True (EUP) changes numerics beyond the 1e-5-level check
    w_all = ez * pl.reciprocal(jnp.sum(ez, axis=0, keepdims=True), approx=False)  # (N, TB)

    # --- dynamical-system mixture, fused into one MXU matmul ---
    # out[d,b] = sum_{i,k} A_i[d,k] * w_all[i,b] * diff[k,b]
    #          = ( A_hstack @ ( (E @ w_all) * tile(diff, N) ) )[d, b]
    w_rep = jnp.dot(e_ref[...], w_all, preferred_element_type=jnp.float32)   # (N*D, TB)
    diff_rep = jnp.concatenate([diff] * n_systems, axis=0)                   # (N*D, TB)
    z = w_rep * diff_rep
    o_ref[...] = jnp.dot(a_ref[...], z,
                         preferred_element_type=jnp.float32).astype(o_ref.dtype)


def andp_forward(x_cur, x_target, w1, b1, w2, b2, a_stack, *, tb_max=512):
    """ANDP forward.  x_cur (B, D), x_target (1, D), w1 (H, D), b1 (1, H),
    w2 (N, H), b2 (1, N), a_stack (N, D, D).  Returns (B, D) float32."""
    batch, ds_dim = x_cur.shape
    n_systems = a_stack.shape[0]
    hidden = w1.shape[0]

    # ---- layout plumbing (pure XLA, once, outside the kernel) ----
    x_t = x_cur.T.astype(jnp.float32)                             # (D, B): batch in lanes
    xt_col = x_target.reshape(ds_dim, 1).astype(jnp.float32)      # (D, 1)
    b1_col = b1.reshape(hidden, 1).astype(jnp.float32)            # (H, 1)
    b2_col = b2.reshape(n_systems, 1).astype(jnp.float32)         # (N, 1)
    # a_hstack[d, i*D + k] = A_i[d, k]
    a_hstack = a_stack.transpose(1, 0, 2).reshape(ds_dim, n_systems * ds_dim)
    a_hstack = a_hstack.astype(jnp.float32)
    # (E @ w_all)[i*D + k, b] = w_all[i, b]
    expand = jnp.kron(jnp.eye(n_systems, dtype=jnp.float32),
                      jnp.ones((ds_dim, 1), jnp.float32))          # (N*D, N)

    # Lane-dense batch tile (multiple of 128); pad the batch to a whole number of tiles.
    tb = min(tb_max, _round_up(batch, 128))
    padded = _round_up(batch, tb)
    if padded != batch:
        x_t = jnp.pad(x_t, ((0, 0), (0, padded - batch)))
    grid = (padded // tb,)

    const = lambda i: (0, 0)  # grid-invariant: DMA'd once, stays VMEM-resident

    out_t = pl.pallas_call(
        functools.partial(_andp_kernel, n_systems=n_systems),
        out_shape=jax.ShapeDtypeStruct((ds_dim, padded), jnp.float32),
        grid=grid,
        in_specs=[
            pl.BlockSpec((ds_dim, tb), lambda i: (0, i)),            # x tile (batch in lanes)
            pl.BlockSpec((ds_dim, 1), const),                        # attractor
            pl.BlockSpec((hidden, ds_dim), const),                   # W1
            pl.BlockSpec((hidden, 1), const),                        # b1
            pl.BlockSpec((n_systems, hidden), const),                # W2
            pl.BlockSpec((n_systems, 1), const),                     # b2
            pl.BlockSpec((ds_dim, n_systems * ds_dim), const),       # A hstack
            pl.BlockSpec((n_systems * ds_dim, n_systems), const),    # expansion matrix
        ],
        out_specs=pl.BlockSpec((ds_dim, tb), lambda i: (0, i)),
        compiler_params=pltpu.CompilerParams(
            dimension_semantics=("parallel",)),                      # megacore on v7x
    )(x_t, xt_col, w1.astype(jnp.float32), b1_col,
      w2.astype(jnp.float32), b2_col, a_hstack, expand)

    return out_t[:, :batch].T                                        # back to (B, D)


def andp_reference(x_cur, x_target, w1, b1, w2, b2, a_stack):
    h = jnp.maximum(x_cur @ w1.T + b1, 0.0)
    w_all = jax.nn.softmax(h @ w2.T + b2, axis=1)
    diff = x_target - x_cur
    out = jnp.zeros_like(x_cur)
    for i in range(a_stack.shape[0]):
        out = out + w_all[:, i:i + 1] * (diff @ a_stack[i].T)
    return out


if __name__ == "__main__":
    ds_dim = 4      # dynamical-system state dim
    N = 4           # number of dynamical systems
    hidden = 10     # default hidden_layers=[10]

    key = jax.random.PRNGKey(0)
    kx, kt, k1, kb1, k2, kb2, kA, kx2 = jax.random.split(key, 8)

    x_target = jax.random.normal(kt, (1, ds_dim), jnp.float32)

    # Weighting MLP parameters (PyTorch Linear weight convention: (out, in)).
    w1 = jax.random.normal(k1, (hidden, ds_dim), jnp.float32) * 0.5
    b1 = jax.random.normal(kb1, (1, hidden), jnp.float32) * 0.1
    w2 = jax.random.normal(k2, (N, hidden), jnp.float32) * 0.5
    b2 = jax.random.normal(kb2, (1, N), jnp.float32) * 0.1

    # A_i = B_i + C_i with B_i PSD and C_i skew-symmetric (geotorch constraints
    # reproduced by construction).
    M = jax.random.normal(kA, (N, ds_dim, ds_dim), jnp.float32)
    B_psd = jnp.einsum("nij,nkj->nik", M, M) / ds_dim
    C_skew = 0.5 * (M - jnp.swapaxes(M, 1, 2))
    a_stack = B_psd + C_skew

    # Small case (single tile) and a larger, non-128-multiple case (padding + 2 grid steps).
    for kb, batch in ((kx, 8), (kx2, 1000)):
        x_cur = jax.random.normal(kb, (batch, ds_dim), jnp.float32)
        out = andp_forward(x_cur, x_target, w1, b1, w2, b2, a_stack)
        jax.block_until_ready(out)
        ref = andp_reference(x_cur, x_target, w1, b1, w2, b2, a_stack)
        assert out.shape == (batch, ds_dim)
        assert jnp.allclose(out, ref, atol=2e-5, rtol=2e-5), (
            batch, float(jnp.max(jnp.abs(out - ref))))

    print("KERNEL_OK")
</pallas_src>

<mosaic_0001>
module attributes {stable_mosaic.version = 11 : i64} {
  func.func @_andp_kernel(%arg0: i32, %arg1: memref<4x128xf32, #tpu.memory_space<vmem>>, %arg2: memref<4x1xf32, #tpu.memory_space<vmem>>, %arg3: memref<10x4xf32, #tpu.memory_space<vmem>>, %arg4: memref<10x1xf32, #tpu.memory_space<vmem>>, %arg5: memref<4x10xf32, #tpu.memory_space<vmem>>, %arg6: memref<4x1xf32, #tpu.memory_space<vmem>>, %arg7: memref<4x16xf32, #tpu.memory_space<vmem>>, %arg8: memref<16x4xf32, #tpu.memory_space<vmem>>, %arg9: memref<4x128xf32, #tpu.memory_space<vmem>>) attributes {dimension_semantics = [#tpu.dimension_semantics<parallel>], iteration_bounds = array<i64: 1>, scalar_prefetch = 0 : i64, scratch_operands = 0 : i64, tpu.core_type = #tpu.core_type<tc>, window_params = [{transform_indices = @transform_0, window_bounds = array<i64: 4, 128>}, {pipeline_mode = #tpu.pipeline_mode<synchronous>, transform_indices = @transform_1, window_bounds = array<i64: 4, 1>}, {pipeline_mode = #tpu.pipeline_mode<synchronous>, transform_indices = @transform_2, window_bounds = array<i64: 10, 4>}, {pipeline_mode = #tpu.pipeline_mode<synchronous>, transform_indices = @transform_3, window_bounds = array<i64: 10, 1>}, {pipeline_mode = #tpu.pipeline_mode<synchronous>, transform_indices = @transform_4, window_bounds = array<i64: 4, 10>}, {pipeline_mode = #tpu.pipeline_mode<synchronous>, transform_indices = @transform_5, window_bounds = array<i64: 4, 1>}, {pipeline_mode = #tpu.pipeline_mode<synchronous>, transform_indices = @transform_6, window_bounds = array<i64: 4, 16>}, {pipeline_mode = #tpu.pipeline_mode<synchronous>, transform_indices = @transform_7, window_bounds = array<i64: 16, 4>}, {transform_indices = @transform_8, window_bounds = array<i64: 4, 128>}]} {
    %c0 = arith.constant 0 : index
    %c0_0 = arith.constant 0 : index
    %0 = vector.load %arg1[%c0, %c0_0] : memref<4x128xf32, #tpu.memory_space<vmem>>, vector<4x128xf32>
    %c0_1 = arith.constant 0 : index
    %c0_2 = arith.constant 0 : index
    %1 = vector.load %arg2[%c0_1, %c0_2] : memref<4x1xf32, #tpu.memory_space<vmem>>, vector<4x1xf32>
    %2 = vector.broadcast %1 : vector<4x1xf32> to vector<4x128xf32>
    %3 = arith.subf %2, %0 : vector<4x128xf32>
    %c0_3 = arith.constant 0 : index
    %c0_4 = arith.constant 0 : index
    %4 = vector.load %arg3[%c0_3, %c0_4] : memref<10x4xf32, #tpu.memory_space<vmem>>, vector<10x4xf32>
    %cst = arith.constant dense<0.000000e+00> : vector<10x128xf32>
    %5 = tpu.matmul %4, %0, %cst {dimension_numbers = #tpu.dot_dimension_numbers<[1], [0], [0], [1], [0, 0, 1, 1], [], []>} : vector<10x4xf32>, vector<4x128xf32>, vector<10x128xf32> -> vector<10x128xf32>
    %c0_5 = arith.constant 0 : index
    %c0_6 = arith.constant 0 : index
    %6 = vector.load %arg4[%c0_5, %c0_6] : memref<10x1xf32, #tpu.memory_space<vmem>>, vector<10x1xf32>
    %7 = vector.broadcast %6 : vector<10x1xf32> to vector<10x128xf32>
    %8 = arith.addf %5, %7 : vector<10x128xf32>
    %cst_7 = arith.constant 0.000000e+00 : f32
    %9 = vector.broadcast %cst_7 : f32 to vector<10x128xf32>
    %10 = arith.maximumf %8, %9 : vector<10x128xf32>
    %c0_8 = arith.constant 0 : index
    %c0_9 = arith.constant 0 : index
    %11 = vector.load %arg5[%c0_8, %c0_9] : memref<4x10xf32, #tpu.memory_space<vmem>>, vector<4x10xf32>
    %cst_10 = arith.constant dense<0.000000e+00> : vector<4x128xf32>
    %12 = tpu.matmul %11, %10, %cst_10 {dimension_numbers = #tpu.dot_dimension_numbers<[1], [0], [0], [1], [0, 0, 1, 1], [], []>} : vector<4x10xf32>, vector<10x128xf32>, vector<4x128xf32> -> vector<4x128xf32>
    %c0_11 = arith.constant 0 : index
    %c0_12 = arith.constant 0 : index
    %13 = vector.load %arg6[%c0_11, %c0_12] : memref<4x1xf32, #tpu.memory_space<vmem>>, vector<4x1xf32>
    %14 = vector.broadcast %13 : vector<4x1xf32> to vector<4x128xf32>
    %15 = arith.addf %12, %14 : vector<4x128xf32>
    %cst_13 = arith.constant dense<0xFF800000> : vector<128xf32>
    %16 = vector.multi_reduction <maximumf>, %15, %cst_13 [0] : vector<4x128xf32> to vector<128xf32>
    %17 = vector.shape_cast %16 : vector<128xf32> to vector<1x128xf32>
    %18 = vector.broadcast %17 : vector<1x128xf32> to vector<4x128xf32>
    %19 = arith.subf %15, %18 : vector<4x128xf32>
    %20 = math.exp %19 : vector<4x128xf32>
    %cst_14 = arith.constant dense<0.000000e+00> : vector<128xf32>
    %21 = vector.multi_reduction <add>, %20, %cst_14 [0] : vector<4x128xf32> to vector<128xf32>
    %22 = vector.shape_cast %21 : vector<128xf32> to vector<1x128xf32>
    %23 = tpu.reciprocal %22 : vector<1x128xf32> -> vector<1x128xf32>
    %24 = vector.broadcast %23 : vector<1x128xf32> to vector<4x128xf32>
    %25 = arith.mulf %20, %24 : vector<4x128xf32>
    %c0_15 = arith.constant 0 : index
    %c0_16 = arith.constant 0 : index
    %26 = vector.load %arg8[%c0_15, %c0_16] : memref<16x4xf32, #tpu.memory_space<vmem>>, vector<16x4xf32>
    %cst_17 = arith.constant dense<0.000000e+00> : vector<16x128xf32>
    %27 = tpu.matmul %26, %25, %cst_17 {dimension_numbers = #tpu.dot_dimension_numbers<[1], [0], [0], [1], [0, 0, 1, 1], [], []>} : vector<16x4xf32>, vector<4x128xf32>, vector<16x128xf32> -> vector<16x128xf32>
    %28 = tpu.concatenate %3, %3, %3, %3 in 0 : vector<4x128xf32>, vector<4x128xf32>, vector<4x128xf32>, vector<4x128xf32> -> vector<16x128xf32>
    %29 = arith.mulf %27, %28 : vector<16x128xf32>
    %c0_18 = arith.constant 0 : index
    %c0_19 = arith.constant 0 : index
    %30 = vector.load %arg7[%c0_18, %c0_19] : memref<4x16xf32, #tpu.memory_space<vmem>>, vector<4x16xf32>
    %cst_20 = arith.constant dense<0.000000e+00> : vector<4x128xf32>
    %31 = tpu.matmul %30, %29, %cst_20 {dimension_numbers = #tpu.dot_dimension_numbers<[1], [0], [0], [1], [0, 0, 1, 1], [], []>} : vector<4x16xf32>, vector<16x128xf32>, vector<4x128xf32> -> vector<4x128xf32>
    %c0_21 = arith.constant 0 : index
    %c0_22 = arith.constant 0 : index
    %32 = vector.load %arg9[%c0_21, %c0_22] : memref<4x128xf32, #tpu.memory_space<vmem>>, vector<4x128xf32>
    tpu.vector_store %arg9[%c0_21, %c0_22], %31 {strides = array<i32>} : memref<4x128xf32, #tpu.memory_space<vmem>>, vector<4x128xf32>,
    return
  }
  func.func @transform_0(%arg0: i32) -> (i32, i32) {
    %c0_i32 = arith.constant 0 : i32
    %c0_i32_0 = arith.constant 0 : i32
    return %c0_i32, %arg0 : i32, i32
  }
  func.func @transform_1(%arg0: i32) -> (i32, i32) {
    %c0_i32 = arith.constant 0 : i32
    %c0_i32_0 = arith.constant 0 : i32
    %c0_i32_1 = arith.constant 0 : i32
    return %c0_i32, %c0_i32_0 : i32, i32
  }
  func.func @transform_2(%arg0: i32) -> (i32, i32) {
    %c0_i32 = arith.constant 0 : i32
    %c0_i32_0 = arith.constant 0 : i32
    %c0_i32_1 = arith.constant 0 : i32
    return %c0_i32, %c0_i32_0 : i32, i32
  }
  func.func @transform_3(%arg0: i32) -> (i32, i32) {
    %c0_i32 = arith.constant 0 : i32
    %c0_i32_0 = arith.constant 0 : i32
    %c0_i32_1 = arith.constant 0 : i32
    return %c0_i32, %c0_i32_0 : i32, i32
  }
  func.func @transform_4(%arg0: i32) -> (i32, i32) {
    %c0_i32 = arith.constant 0 : i32
    %c0_i32_0 = arith.constant 0 : i32
    %c0_i32_1 = arith.constant 0 : i32
    return %c0_i32, %c0_i32_0 : i32, i32
  }
  func.func @transform_5(%arg0: i32) -> (i32, i32) {
    %c0_i32 = arith.constant 0 : i32
    %c0_i32_0 = arith.constant 0 : i32
    %c0_i32_1 = arith.constant 0 : i32
    return %c0_i32, %c0_i32_0 : i32, i32
  }
  func.func @transform_6(%arg0: i32) -> (i32, i32) {
    %c0_i32 = arith.constant 0 : i32
    %c0_i32_0 = arith.constant 0 : i32
    %c0_i32_1 = arith.constant 0 : i32
    return %c0_i32, %c0_i32_0 : i32, i32
  }
  func.func @transform_7(%arg0: i32) -> (i32, i32) {
    %c0_i32 = arith.constant 0 : i32
    %c0_i32_0 = arith.constant 0 : i32
    %c0_i32_1 = arith.constant 0 : i32
    return %c0_i32, %c0_i32_0 : i32, i32
  }
  func.func @transform_8(%arg0: i32) -> (i32, i32) {
    %c0_i32 = arith.constant 0 : i32
    %c0_i32_0 = arith.constant 0 : i32
    return %c0_i32, %arg0 : i32, i32
  }
}

</mosaic_0001>

<bundles_post_ra>
// kernel: tpu_custom_call.1
= control target key start
LH: loop header
LB: loop body
LE: loop exit
PB: predicated region body
PF: predicated region fallthrough
CT: control target
= control target key end

     0   :  { %vm59_vm0 = vcmask 1043456   ;;  %vm52_vm1 = vcmask 31744   ;;  %v503_v4 = vmov 0   ;;  %s612_s0 = inlined_call_operand.vmem [shape: f32[4,128], index: 0, kind: input, shape index: {}]   ;;  %s613_s1 = inlined_call_operand.vmem [shape: f32[4,1], index: 1, kind: input, shape index: {}]   ;;  %s614_s2 = inlined_call_operand.vmem [shape: f32[10,4], index: 2, kind: input, shape index: {}]   ;;  %s615_s3 = inlined_call_operand.vmem [shape: f32[10,1], index: 3, kind: input, shape index: {}]   ;;  %s616_s4 = inlined_call_operand.vmem [shape: f32[4,10], index: 4, kind: input, shape index: {}]   ;;  %s617_s5 = inlined_call_operand.vmem [shape: f32[4,1], index: 5, kind: input, shape index: {}]   ;;  %s618_s6 = inlined_call_operand.vmem [shape: f32[4,16], index: 6, kind: input, shape index: {}]   ;;  %s619_s7 = inlined_call_operand.vmem [shape: f32[16,4], index: 7, kind: input, shape index: {}]   ;;  %s620_s8 = inlined_call_operand.hbm [shape: f32[4,128], index: 8, kind: output, shape index: {}]  }
   0x1   :  { %v555_v0 = vld [vmem:[%s612_s0] sm:$0xf]  ;;  %v39_v2 = vld [vmem:[%s614_s2 + $0x8] sm:$0x3]  ;;  %475 = vset.pattern.permute.xlu0 %v503_v4 }
   0x2   :  { %v38_v1 = vld [vmem:[%s614_s2] sm:$0xff]  ;;  %447 = vmatprep.subr.msk.mxu0 %vm59_vm0, %v555_v0  ;;  %v41_v3 = vld [vmem:[%s615_s3 + $0x8] sm:$0x3] }
   0x3   :  { %449 = vmatprep.mubr.msk.f32.mxu0 %vm52_vm1, %v38_v1  ;;  %448 = vmatpush3.msk.msra.mxu0 %vm59_vm0, %v555_v0 }
   0x4   :  { %13 = vsyncpa [#allocation3], 0  ;;  %450 = vmatmul.mubr.msk.f32.vlgmr.msra.gmra.mxu0 %vm52_vm1, %v39_v2  ;;  %49 = vperm.xlu0 %475, %v41_v3   ;;  %v40_v5 = vld [vmem:[%s615_s3] sm:$0xff]  ;;  %v504_v6 = vmov 0.0   ;;  %vm505_vm2 = vmmov 0   ;;  %vm151_vm3 = vcmask 1041408  }
   0x5   :  { %476 = vset.pattern.permute.xlu1 %v503_v4  ;;  %452 = vmatprep.subr.mxu1 %v504_v6  ;;  %v141_v7 = vld [vmem:[%s617_s5] sm:$0xf]  ;;  %vm147_vm4 = vcmask 80896   ;;  %v245_v42 = vld [vmem:[%s619_s7 + $0x8] sm:$0xff]  ;;  %vm337_vm5 = vcmask 130048  }
   0x6   :  { %456 = vmatprep.mubr.msk.f32.mxu1 %vm505_vm2, %v504_v6  ;;  %144 = vperm.xlu1 %476, %v141_v7   ;;  %v31_v8 = vld [vmem:[%s613_s1] sm:$0xf] }
   0x7   :  { %v140_v17 = vld [vmem:[%s616_s4] sm:$0xf] }
   0x8   :  { %44 = vperm.xlu0 %475, %v40_v5   ;;  %v244_v18 = vld [vmem:[%s619_s7] sm:$0xff]  ;;  %s506_s7 = smov [#allocation2]  }
   0x9   :  { %461 = vmatprep.mubr.msk.f32.mxu0 %vm52_vm1, %v244_v18  ;;  %v336_v51 = vld [vmem:[%s618_s6] sm:$0xf]  ;;  %s418_s21 = sshll.u32 %s506_s7, 4  ;;  %s419_s21 = int_to_ptr.vmem [resolvable:$true] %s418_s21 }
   0xa   :  { %34 = vperm.xlu1 %476, %v31_v8   ;;  %s481_s22 = scalar_lea.vmem %s419_s21, 64  ;;  %p486_p1 = scmp.lt.s32.totalorder %s419_s21, %s419_s21 }
   0xb   :  { %p482_p0 = scmp.ne.s32.totalorder %s419_s21, %s481_s22  ;;  %p487_p2 = scmp.lt.s32.totalorder %s481_s22, %s481_s22 }
   0xd   :  { %p488_p3 = por %p487_p2, %p486_p1 }
   0xf   :  { %p489_p4 = pnand %p488_p3, %p482_p0 }
  0x7f   :  { %v50_v9 = vpop.permute.xlu0 %49 }
  0x81   :  { %v145_v19 = vpop.permute.xlu1 %144 }
  0x83   :  { %v45_v12 = vpop.permute.xlu0 %44 }
  0x85   :  { %v35_v43 = vpop.permute.xlu1 %34 }
  0x86   :  { %v37_v44 = vsub.f32 %v35_v43, %v555_v0 }
  0x88   :  { %v331_v45 = vrot.slane %v37_v44, 4 }
  0x8a   :  { %v333_v47 = vsel %vm59_vm0, %v37_v44, %v331_v45 }
  0xc4   :  { %v451_v10 = vpop.f32.mrf.mxu0 }
  0xc5   :  { %v135_v11 = vadd.f32 %v451_v10, %v50_v9 }
  0xc6   :  { %v129_v13 = vpop.f32.mrf.mxu0 }
  0xc7   :  { %v139_v14 = vmax.f32 %v135_v11, 0.0  ;;  %v130_v15 = vadd.f32 %v129_v13, %v45_v12 }
  0xc9   :  { %v138_v16 = vmax.f32 %v130_v15, 0.0  ;;  %453 = vmatpush3.msk.msra.mxu1 %vm151_vm3, %v139_v14 }
  0xca   :  { %454 = vmatprep.subr.mxu1 %v504_v6 }
  0xcb   :  { %455 = vmatpush3.msra.mxu1 %v138_v16 }
  0xcc   :  { %457 = vmatmul.mubr.msk.f32.vlgmr.msra.gmra.mxu1 %vm147_vm4, %v140_v17  ;;  %464 = vmatprep.subr.mxu1 %v504_v6 }
  0xcd   :  { %468 = vmatprep.mubr.msk.f32.mxu1 %vm505_vm2, %v504_v6 }
 0x18c   :  { %v221_v20 = vpop.f32.mrf.mxu1 }
 0x18d   :  { %v222_v21 = vadd.f32 %v221_v20, %v145_v19 }
 0x18e   :  { %v458_v22 = vpop.f32.mrf.mxu1 }
 0x18f   :  { %v225_v23 = vsel %vm59_vm0, %v222_v21, -inf }
 0x190   :  { %v226_v24 = vrot.slane %v225_v23, 4 }
 0x192   :  { %v227_v25 = vmax.f32 %v225_v23, %v226_v24 }
 0x194   :  { %v228_v26 = vrot.slane %v227_v25, 2 }
 0x196   :  { %v229_v27 = vmax.f32 %v227_v25, %v228_v26 }
 0x198   :  { %v230_v28 = vrot.slane %v229_v27, 1 }
 0x19a   :  { %v231_v29 = vmax.f32 %v229_v27, %v230_v28 }
 0x19c   :  { %v232_v30 = vsub.f32 %v222_v21, %v231_v29 }
 0x19e   :  { %v233_v31 = vmul.f32 1.442695, %v232_v30 }
 0x1a0   :  { %477 = vpow2.f32 %v233_v31 }
 0x1ad   :  { %v478_v32 = vpop.eup %477 }
 0x1ae   :  { %v235_v33 = vsel %vm59_vm0, %v478_v32, 0.0 }
 0x1af   :  { %v236_v34 = vrot.slane %v235_v33, 4 }
 0x1b1   :  { %v237_v35 = vadd.f32 %v236_v34, %v235_v33 }
 0x1b3   :  { %v238_v36 = vrot.slane %v237_v35, 2 }
 0x1b5   :  { %v239_v37 = vadd.f32 %v238_v36, %v237_v35 }
 0x1b7   :  { %v240_v38 = vrot.slane %v239_v37, 1 }
 0x1b9   :  { %v241_v39 = vadd.f32 %v240_v38, %v239_v37 }
 0x1bb   :  { %479 = vrcp.f32 %v241_v39 }
 0x1c8   :  { %v480_v40 = vpop.eup %479 }
 0x1c9   :  { %v243_v41 = vmul.f32 %v480_v40, %v478_v32 }
 0x1cb   :  { %459 = vmatprep.subr.msk.mxu0 %vm59_vm0, %v243_v41 }
 0x1cc   :  { %460 = vmatpush3.msk.msra.mxu0 %vm59_vm0, %v243_v41 }
 0x1cd   :  { %462 = vmatmul.mubr.msk.f32.vlgmr.msra.gmra.mxu0 %vm52_vm1, %v245_v42 }
 0x28d   :  { %v463_v46 = vpop.f32.mrf.mxu0 }
 0x28e   :  { %v335_v48 = vmul.f32 %v463_v46, %v333_v47 }
 0x28f   :  { %v321_v49 = vpop.f32.mrf.mxu0 }
 0x290   :  { %v334_v50 = vmul.f32 %v333_v47, %v321_v49  ;;  %465 = vmatpush3.msra.mxu1 %v335_v48 }
 0x291   :  { %466 = vmatprep.subr.mxu1 %v504_v6 }
 0x292   :  { %467 = vmatpush3.msra.mxu1 %v334_v50 }
 0x293   :  { %469 = vmatmul.mubr.msk.f32.vlgmr.msra.gmra.mxu1 %vm337_vm5, %v336_v51 }
 0x353   :  { %v407_v52 = vpop.f32.mrf.mxu1 }
 0x354   :  { %411 = vst [vmem:[#allocation2] sm:$0xf] %v407_v52 }
 0x355   :  { %v470_v53 = vpop.f32.mrf.mxu1 }
 0x356   :  { %492 = shalt.err (!%p489_p4)
}
 0x357   :  { %421 = dma.vmem_to_hbm [thread:$0]  %s419_s21, 64, %s620_s8, [#allocation3]  }
 0x358   :  { %501 = dma.done.wait [#allocation3], 64  }
 0x359   :  { %502 = vsyncadd [#allocation3], 4294967232 }
 0x35a   :  { %425 = vsyncpa [#allocation3], 1 }

</bundles_post_ra>
